<compile_context>
chip_gen: v7x
topology: tpu7x:2x2x1
jax: 0.10.0
libtpu: 0.0.40
codegen_flags: <defaults>
</compile_context>

<pallas_src>
import math

import jax
import jax.numpy as jnp
import numpy as np
from jax.experimental import pallas as pl
from jax.experimental.pallas import tpu as pltpu

# ----------------------------- model config (small) -----------------------------
INPUT_DIM = 16
D_MODEL = 32
NHEAD = 4
NUM_LAYERS = 2
DIM_FF = 64
NUM_CLASSES = 5
BATCH = 2
SEQ = 8
HEAD_DIM = D_MODEL // NHEAD
N_ROWS = BATCH * SEQ        # canonical 2-D activation slab is [N_ROWS, D_MODEL]
EPS = 1e-5                  # nn.LayerNorm default eps
PARAM_W = 128               # lane width of the single packed parameter slab
OUT_ROWS = 8                # lane-dense padded output slab is [OUT_ROWS, PARAM_W]


# -------------------- static layout of the single packed parameter slab --------------------
def _build_layout():
    layout = {}
    off = 0

    def add(name, nrows, ncols):
        nonlocal off
        layout[name] = (off, nrows, ncols)
        off += ((nrows + 7) // 8) * 8          # keep every block 8-sublane aligned

    add('w_in', INPUT_DIM, D_MODEL)            # input projection, [in, out]
    add('bias_pe', N_ROWS, D_MODEL)            # input bias + positional encoding, per row
    add('hmask', D_MODEL, D_MODEL)             # block-diagonal per-head indicator
    for l in range(NUM_LAYERS):
        add(f'w_qkv_{l}', D_MODEL, 3 * D_MODEL)  # fused [Wq*scale | Wk | Wv], [in, 3*out]
        add(f'wo_{l}', D_MODEL, D_MODEL)
        add(f'w1_{l}', D_MODEL, DIM_FF)
        add(f'w2_{l}', DIM_FF, D_MODEL)
        add(f'vec_{l}', 8, PARAM_W)            # 8 packed bias / LayerNorm vector rows
    add('mavg', 8, N_ROWS)                     # mean-pool matrix (rows >= BATCH are zero)
    add('wc1', D_MODEL, D_MODEL // 2)
    add('cvec', 8, PARAM_W)                    # row 0: bc1, row 1: bc2 (lane-padded)
    add('wc2', D_MODEL // 2, PARAM_W)          # wc2.T padded to 128 lanes
    return layout, off


LAYOUT, TOTAL_ROWS = _build_layout()

# meaning of the 8 rows in each per-layer vector block
_VB_BQKV, _VB_BO, _VB_B1, _VB_B2, _VB_G1, _VB_BE1, _VB_G2, _VB_BE2 = range(8)


# ----------------------------- in-kernel helpers -----------------------------
def _layer_norm(x, g, b):
    mu = jnp.mean(x, axis=-1, keepdims=True)
    var = jnp.mean((x - mu) * (x - mu), axis=-1, keepdims=True)
    return (x - mu) * jax.lax.rsqrt(var + EPS) * g + b


def _shift_rows(a, t):
    """result[r] = a[(r + t) % N_ROWS] — one XLU sublane rotate (static, tile-aligned)."""
    t = t % N_ROWS
    if t == 0:
        return a
    return pltpu.roll(a, N_ROWS - t, axis=0)


# ----------------------------- the single fused kernel -----------------------------
def fused_transformer_kernel(x_ref, p_ref, out_ref):
    f32 = jnp.float32
    D = D_MODEL

    def block(name):
        r0, nr, nc = LAYOUT[name]
        return p_ref[r0:r0 + nr, 0:nc]

    def vec_row(name, i, width):
        r0, _, _ = LAYOUT[name]
        return p_ref[r0 + i:r0 + i + 1, 0:width]

    # Input projection + (input bias + positional encoding) in a single add.
    # Rows are batch-major: r = b*SEQ + s  (PE indexed by b: module quirk, precomputed).
    h = jnp.dot(x_ref[...], block('w_in'), preferred_element_type=f32) + block('bias_pe')

    # Block-diagonal head indicator (precomputed): hmask[i, j] = 1 iff i//HEAD_DIM == j//HEAD_DIM.
    # (q*k) @ hmask gives per-head score sums, already broadcast over each head's lanes.
    hmask = block('hmask')

    for layer in range(NUM_LAYERS):
        vname = f'vec_{layer}'

        # Fused Q/K/V projection: one [N_ROWS, D] x [D, 3D] matmul, then static lane slices.
        # 1/sqrt(HEAD_DIM) is pre-folded into the Q columns / Q bias at pack time.
        qkv = jnp.dot(h, block(f'w_qkv_{layer}'), preferred_element_type=f32) \
            + vec_row(vname, _VB_BQKV, 3 * D)
        q = qkv[:, 0:D]
        k = qkv[:, D:2 * D]
        v = qkv[:, 2 * D:3 * D]

        # Self-attention over the BATCH axis (batched over seq), as in the reference's
        # batch_first=False usage.  In the batch-major flat layout the attention partners
        # of row r are rows (r + j*SEQ) % N_ROWS, j = 0..BATCH-1, i.e. BATCH cyclic
        # row shifts (sublane rotates) — no per-head slicing, no 3-D/4-D views.
        scores = [jnp.dot(q * _shift_rows(k, j * SEQ), hmask, preferred_element_type=f32)
                  for j in range(BATCH)]                      # each [N_ROWS, D]
        m = scores[0]
        for s in scores[1:]:
            m = jnp.maximum(m, s)
        probs = [jnp.exp(s - m) for s in scores]
        denom = probs[0]
        for pj in probs[1:]:
            denom = denom + pj
        ctx = probs[0] * v
        for j in range(1, BATCH):
            ctx = ctx + probs[j] * _shift_rows(v, j * SEQ)
        ctx = ctx * pl.reciprocal(denom, approx=True)         # softmax denom on EUP

        attn = jnp.dot(ctx, block(f'wo_{layer}'), preferred_element_type=f32) \
            + vec_row(vname, _VB_BO, D)
        h = _layer_norm(h + attn, vec_row(vname, _VB_G1, D), vec_row(vname, _VB_BE1, D))

        ff = jnp.maximum(
            jnp.dot(h, block(f'w1_{layer}'), preferred_element_type=f32)
            + vec_row(vname, _VB_B1, DIM_FF), 0.0)
        ff = jnp.dot(ff, block(f'w2_{layer}'), preferred_element_type=f32) \
            + vec_row(vname, _VB_B2, D)
        h = _layer_norm(h + ff, vec_row(vname, _VB_G2, D), vec_row(vname, _VB_BE2, D))

    # Mean over the sequence axis = mean over contiguous SEQ-row blocks, via one tiny
    # matmul against the precomputed [8, N_ROWS] pooling matrix (rows >= BATCH are zero,
    # which keeps the rest of the epilogue lane/sublane dense; junk rows are sliced off
    # in the wrapper).
    pooled = jnp.dot(block('mavg'), h, preferred_element_type=f32)          # [8, D]

    z = jnp.maximum(
        jnp.dot(pooled, block('wc1'), preferred_element_type=f32)
        + vec_row('cvec', 0, D // 2), 0.0)                                  # [8, D//2]
    # wc2 is pre-padded to 128 lanes -> lane-dense [8, 128] store (logits in [0:2, 0:5]).
    out_ref[...] = jnp.dot(z, block('wc2'), preferred_element_type=f32) \
        + vec_row('cvec', 1, PARAM_W)


# ----------------------------- pallas_call wrapper -----------------------------
def _vmem_spec():
    return pl.BlockSpec(memory_space=pltpu.MemorySpace.VMEM)


@jax.jit
def transformer_classifier_forward(x, param_slab):
    """x: [BATCH, SEQ, INPUT_DIM], param_slab: [TOTAL_ROWS, 128] -> logits [BATCH, NUM_CLASSES]."""
    # Contiguous flatten (free view) to the canonical batch-major 2-D slab; no transpose.
    x2 = x.reshape(N_ROWS, INPUT_DIM)
    out = pl.pallas_call(
        fused_transformer_kernel,
        out_shape=jax.ShapeDtypeStruct((OUT_ROWS, PARAM_W), jnp.float32),
        in_specs=[_vmem_spec(), _vmem_spec()],
        out_specs=_vmem_spec(),
    )(x2, param_slab)
    return out[0:BATCH, 0:NUM_CLASSES]


# ----------------------------- parameters -----------------------------
def _pe_table(n, d):
    """PositionalEncoding buffer rows 0..n-1 (sin/cos interleaved), shape [n, d]."""
    pos = jnp.arange(n, dtype=jnp.float32)[:, None]
    div = jnp.exp(jnp.arange(0, d, 2, dtype=jnp.float32) * (-math.log(10000.0) / d))
    return jnp.stack([jnp.sin(pos * div), jnp.cos(pos * div)], axis=-1).reshape(n, d)


def init_params(key):
    """PyTorch-layout parameters (nn.Linear weight = [out, in], bias = [out])."""
    def nrm(k, shape, scale=0.05):
        return scale * jax.random.normal(k, shape, dtype=jnp.float32)

    keys = iter(jax.random.split(key, 8 * NUM_LAYERS + 8))
    params = {
        'w_in': nrm(next(keys), (D_MODEL, INPUT_DIM)),
        'b_in': nrm(next(keys), (D_MODEL,)),
        'layers': [],
    }
    for _ in range(NUM_LAYERS):
        params['layers'].append({
            'w_qkv': nrm(next(keys), (3 * D_MODEL, D_MODEL)),
            'b_qkv': nrm(next(keys), (3 * D_MODEL,)),
            'wo': nrm(next(keys), (D_MODEL, D_MODEL)),
            'bo': nrm(next(keys), (D_MODEL,)),
            'w1': nrm(next(keys), (DIM_FF, D_MODEL)),
            'b1': nrm(next(keys), (DIM_FF,)),
            'w2': nrm(next(keys), (D_MODEL, DIM_FF)),
            'b2': nrm(next(keys), (D_MODEL,)),
            'g1': jnp.ones((D_MODEL,), jnp.float32),
            'be1': jnp.zeros((D_MODEL,), jnp.float32),
            'g2': jnp.ones((D_MODEL,), jnp.float32),
            'be2': jnp.zeros((D_MODEL,), jnp.float32),
        })
    params['wc1'] = nrm(next(keys), (D_MODEL // 2, D_MODEL))
    params['bc1'] = nrm(next(keys), (D_MODEL // 2,))
    params['wc2'] = nrm(next(keys), (NUM_CLASSES, D_MODEL // 2))
    params['bc2'] = nrm(next(keys), (NUM_CLASSES,))
    return params


def pack_params(p):
    """One-time host-side packing of every weight/bias/constant into a single lane-dense
    [TOTAL_ROWS, 128] f32 slab: weights transposed to [in, out], attention scale folded
    into W_q / b_q, (input bias + PE) precomputed per row, head mask / pooling matrix
    precomputed, classifier output weight padded to 128 lanes."""
    scale = 1.0 / math.sqrt(HEAD_DIM)
    slab = np.zeros((TOTAL_ROWS, PARAM_W), np.float32)

    def put(name, arr):
        arr = np.asarray(arr, np.float32)
        if arr.ndim == 1:
            arr = arr[None, :]
        r0, nr, nc = LAYOUT[name]
        assert arr.shape == (nr, nc), (name, arr.shape, (nr, nc))
        slab[r0:r0 + nr, :nc] = arr

    put('w_in', np.asarray(p['w_in']).T)

    # PE is indexed by the BATCH index (module quirk); rows are batch-major (r = b*SEQ+s).
    pe_rows = np.repeat(np.asarray(_pe_table(BATCH, D_MODEL)), SEQ, axis=0)   # [N_ROWS, D]
    put('bias_pe', pe_rows + np.asarray(p['b_in'])[None, :])

    hi = np.arange(D_MODEL)[:, None] // HEAD_DIM
    hj = np.arange(D_MODEL)[None, :] // HEAD_DIM
    put('hmask', (hi == hj).astype(np.float32))

    for l, lp in enumerate(p['layers']):
        wq, wk, wv = np.split(np.asarray(lp['w_qkv']), 3, axis=0)
        bq, bk, bv = np.split(np.asarray(lp['b_qkv']), 3)
        put(f'w_qkv_{l}', np.concatenate([wq.T * scale, wk.T, wv.T], axis=1))  # [D, 3D]
        put(f'wo_{l}', np.asarray(lp['wo']).T)
        put(f'w1_{l}', np.asarray(lp['w1']).T)
        put(f'w2_{l}', np.asarray(lp['w2']).T)

        vec = np.zeros((8, PARAM_W), np.float32)
        vec[_VB_BQKV, :3 * D_MODEL] = np.concatenate([bq * scale, bk, bv])
        vec[_VB_BO, :D_MODEL] = np.asarray(lp['bo'])
        vec[_VB_B1, :DIM_FF] = np.asarray(lp['b1'])
        vec[_VB_B2, :D_MODEL] = np.asarray(lp['b2'])
        vec[_VB_G1, :D_MODEL] = np.asarray(lp['g1'])
        vec[_VB_BE1, :D_MODEL] = np.asarray(lp['be1'])
        vec[_VB_G2, :D_MODEL] = np.asarray(lp['g2'])
        vec[_VB_BE2, :D_MODEL] = np.asarray(lp['be2'])
        put(f'vec_{l}', vec)

    mavg = np.zeros((8, N_ROWS), np.float32)
    for b in range(BATCH):
        mavg[b, b * SEQ:(b + 1) * SEQ] = 1.0 / SEQ
    put('mavg', mavg)

    put('wc1', np.asarray(p['wc1']).T)

    cvec = np.zeros((8, PARAM_W), np.float32)
    cvec[0, :D_MODEL // 2] = np.asarray(p['bc1'])
    cvec[1, :NUM_CLASSES] = np.asarray(p['bc2'])
    put('cvec', cvec)

    wc2_wide = np.zeros((D_MODEL // 2, PARAM_W), np.float32)
    wc2_wide[:, :NUM_CLASSES] = np.asarray(p['wc2']).T
    put('wc2', wc2_wide)

    return jnp.asarray(slab)


# ----------------------------- pure-JAX reference (mirrors the PyTorch module) ---------
def _ref_layer_norm(x, g, b):
    mu = jnp.mean(x, axis=-1, keepdims=True)
    var = jnp.mean((x - mu) ** 2, axis=-1, keepdims=True)
    return (x - mu) / jnp.sqrt(var + EPS) * g + b


def _reference_forward(x, params):
    scale = 1.0 / math.sqrt(HEAD_DIM)
    h = x @ params['w_in'].T + params['b_in']                     # [B, S, D]
    h = h + _pe_table(BATCH, D_MODEL)[:, None, :]                 # PE indexed by batch (dim 0)
    for lp in params['layers']:
        wq, wk, wv = jnp.split(lp['w_qkv'], 3, axis=0)
        bq, bk, bv = jnp.split(lp['b_qkv'], 3)
        q = (h @ wq.T + bq) * scale
        k = h @ wk.T + bk
        v = h @ wv.T + bv

        def split_heads(t):  # [B, S, D] -> [S, H, B, hd]; attention length axis = BATCH
            return t.reshape(BATCH, SEQ, NHEAD, HEAD_DIM).transpose(1, 2, 0, 3)

        qh, kh, vh = split_heads(q), split_heads(k), split_heads(v)
        s = jnp.einsum('shld,shmd->shlm', qh, kh)
        p_ = jax.nn.softmax(s, axis=-1)
        o = jnp.einsum('shlm,shmd->shld', p_, vh)
        o = o.transpose(2, 0, 1, 3).reshape(BATCH, SEQ, D_MODEL)
        attn = o @ lp['wo'].T + lp['bo']
        h = _ref_layer_norm(h + attn, lp['g1'], lp['be1'])
        ff = jax.nn.relu(h @ lp['w1'].T + lp['b1']) @ lp['w2'].T + lp['b2']
        h = _ref_layer_norm(h + ff, lp['g2'], lp['be2'])
    pooled = jnp.mean(h, axis=1)                                  # mean over seq
    z = jax.nn.relu(pooled @ params['wc1'].T + params['bc1'])
    return z @ params['wc2'].T + params['bc2']


# ----------------------------- main -----------------------------
if __name__ == "__main__":
    key = jax.random.PRNGKey(0)
    kx, kp = jax.random.split(key)
    x = jax.random.normal(kx, (BATCH, SEQ, INPUT_DIM), dtype=jnp.float32)

    params = init_params(kp)
    slab = pack_params(params)

    out = transformer_classifier_forward(x, slab)
    out = jax.block_until_ready(out)

    assert out.shape == (BATCH, NUM_CLASSES)
    assert bool(jnp.all(jnp.isfinite(out)))

    # Sanity check against a plain-JAX mirror of the PyTorch module (loose tolerance
    # accounts for the approximate softmax reciprocal and MXU accumulation order).
    ref = _reference_forward(x, params)
    assert bool(jnp.allclose(out, ref, atol=1e-2, rtol=1e-2))

    print("KERNEL_OK")
</pallas_src>

<mosaic_0001>
module attributes {stable_mosaic.version = 11 : i64} {
  func.func @fused_transformer_kernel(%arg0: memref<16x16xf32, #tpu.memory_space<vmem>>, %arg1: memref<464x128xf32, #tpu.memory_space<vmem>>, %arg2: memref<8x128xf32, #tpu.memory_space<vmem>>) attributes {dimension_semantics = [], scalar_prefetch = 0 : i64, scratch_operands = 0 : i64, tpu.core_type = #tpu.core_type<tc>} {
    %c0 = arith.constant 0 : index
    %c0_0 = arith.constant 0 : index
    %0 = vector.load %arg0[%c0, %c0_0] : memref<16x16xf32, #tpu.memory_space<vmem>>, vector<16x16xf32>
    %c0_1 = arith.constant 0 : index
    %c0_2 = arith.constant 0 : index
    %1 = vector.load %arg1[%c0_1, %c0_2] : memref<464x128xf32, #tpu.memory_space<vmem>>, vector<16x32xf32>
    %cst = arith.constant dense<0.000000e+00> : vector<16x32xf32>
    %2 = tpu.matmul %0, %1, %cst {dimension_numbers = #tpu.dot_dimension_numbers<[1], [0], [0], [1], [0, 0, 1, 1], [], []>} : vector<16x16xf32>, vector<16x32xf32>, vector<16x32xf32> -> vector<16x32xf32>
    %c16 = arith.constant 16 : index
    %c0_3 = arith.constant 0 : index
    %3 = vector.load %arg1[%c16, %c0_3] : memref<464x128xf32, #tpu.memory_space<vmem>>, vector<16x32xf32>
    %4 = arith.addf %2, %3 : vector<16x32xf32>
    %c32 = arith.constant 32 : index
    %c0_4 = arith.constant 0 : index
    %5 = vector.load %arg1[%c32, %c0_4] : memref<464x128xf32, #tpu.memory_space<vmem>>, vector<32x32xf32>
    %c64 = arith.constant 64 : index
    %c0_5 = arith.constant 0 : index
    %6 = vector.load %arg1[%c64, %c0_5] : memref<464x128xf32, #tpu.memory_space<vmem>>, vector<32x96xf32>
    %cst_6 = arith.constant dense<0.000000e+00> : vector<16x96xf32>
    %7 = tpu.matmul %4, %6, %cst_6 {dimension_numbers = #tpu.dot_dimension_numbers<[1], [0], [0], [1], [0, 0, 1, 1], [], []>} : vector<16x32xf32>, vector<32x96xf32>, vector<16x96xf32> -> vector<16x96xf32>
    %c224 = arith.constant 224 : index
    %c0_7 = arith.constant 0 : index
    %8 = vector.load %arg1[%c224, %c0_7] : memref<464x128xf32, #tpu.memory_space<vmem>>, vector<1x96xf32>
    %9 = vector.broadcast %8 : vector<1x96xf32> to vector<16x96xf32>
    %10 = arith.addf %7, %9 : vector<16x96xf32>
    %11 = vector.extract_strided_slice %10 {offsets = [0, 0], sizes = [16, 32], strides = [1, 1]} : vector<16x96xf32> to vector<16x32xf32>
    %12 = vector.extract_strided_slice %10 {offsets = [0, 32], sizes = [16, 32], strides = [1, 1]} : vector<16x96xf32> to vector<16x32xf32>
    %13 = vector.extract_strided_slice %10 {offsets = [0, 64], sizes = [16, 32], strides = [1, 1]} : vector<16x96xf32> to vector<16x32xf32>
    %14 = arith.mulf %11, %12 : vector<16x32xf32>
    %cst_8 = arith.constant dense<0.000000e+00> : vector<16x32xf32>
    %15 = tpu.matmul %14, %5, %cst_8 {dimension_numbers = #tpu.dot_dimension_numbers<[1], [0], [0], [1], [0, 0, 1, 1], [], []>} : vector<16x32xf32>, vector<32x32xf32>, vector<16x32xf32> -> vector<16x32xf32>
    %c8_i32 = arith.constant 8 : i32
    %16 = tpu.dynamic_rotate %12 by %c8_i32 dim 0 : vector<16x32xf32>, i32 -> vector<16x32xf32>
    %17 = arith.mulf %11, %16 : vector<16x32xf32>
    %cst_9 = arith.constant dense<0.000000e+00> : vector<16x32xf32>
    %18 = tpu.matmul %17, %5, %cst_9 {dimension_numbers = #tpu.dot_dimension_numbers<[1], [0], [0], [1], [0, 0, 1, 1], [], []>} : vector<16x32xf32>, vector<32x32xf32>, vector<16x32xf32> -> vector<16x32xf32>
    %19 = arith.maximumf %15, %18 : vector<16x32xf32>
    %20 = arith.subf %15, %19 : vector<16x32xf32>
    %21 = math.exp %20 : vector<16x32xf32>
    %22 = arith.subf %18, %19 : vector<16x32xf32>
    %23 = math.exp %22 : vector<16x32xf32>
    %24 = arith.addf %21, %23 : vector<16x32xf32>
    %25 = arith.mulf %21, %13 : vector<16x32xf32>
    %c8_i32_10 = arith.constant 8 : i32
    %26 = tpu.dynamic_rotate %13 by %c8_i32_10 dim 0 : vector<16x32xf32>, i32 -> vector<16x32xf32>
    %27 = arith.mulf %23, %26 : vector<16x32xf32>
    %28 = arith.addf %25, %27 : vector<16x32xf32>
    %29 = tpu.reciprocal %24 {approx = true} : vector<16x32xf32> -> vector<16x32xf32>
    %30 = arith.mulf %28, %29 : vector<16x32xf32>
    %c96 = arith.constant 96 : index
    %c0_11 = arith.constant 0 : index
    %31 = vector.load %arg1[%c96, %c0_11] : memref<464x128xf32, #tpu.memory_space<vmem>>, vector<32x32xf32>
    %cst_12 = arith.constant dense<0.000000e+00> : vector<16x32xf32>
    %32 = tpu.matmul %30, %31, %cst_12 {dimension_numbers = #tpu.dot_dimension_numbers<[1], [0], [0], [1], [0, 0, 1, 1], [], []>} : vector<16x32xf32>, vector<32x32xf32>, vector<16x32xf32> -> vector<16x32xf32>
    %c225 = arith.constant 225 : index
    %c0_13 = arith.constant 0 : index
    %33 = vector.load %arg1[%c225, %c0_13] : memref<464x128xf32, #tpu.memory_space<vmem>>, vector<1x32xf32>
    %34 = vector.broadcast %33 : vector<1x32xf32> to vector<16x32xf32>
    %35 = arith.addf %32, %34 : vector<16x32xf32>
    %36 = arith.addf %4, %35 : vector<16x32xf32>
    %c228 = arith.constant 228 : index
    %c0_14 = arith.constant 0 : index
    %37 = vector.load %arg1[%c228, %c0_14] : memref<464x128xf32, #tpu.memory_space<vmem>>, vector<1x32xf32>
    %c229 = arith.constant 229 : index
    %c0_15 = arith.constant 0 : index
    %38 = vector.load %arg1[%c229, %c0_15] : memref<464x128xf32, #tpu.memory_space<vmem>>, vector<1x32xf32>
    %cst_16 = arith.constant dense<0.000000e+00> : vector<16xf32>
    %39 = vector.multi_reduction <add>, %36, %cst_16 [1] : vector<16x32xf32> to vector<16xf32>
    %40 = vector.shape_cast %39 : vector<16xf32> to vector<16x1xf32>
    %cst_17 = arith.constant 3.200000e+01 : f32
    %41 = vector.broadcast %cst_17 : f32 to vector<16x1xf32>
    %42 = arith.divf %40, %41 : vector<16x1xf32>
    %43 = vector.broadcast %42 : vector<16x1xf32> to vector<16x32xf32>
    %44 = arith.subf %36, %43 : vector<16x32xf32>
    %45 = vector.broadcast %42 : vector<16x1xf32> to vector<16x32xf32>
    %46 = arith.subf %36, %45 : vector<16x32xf32>
    %47 = arith.mulf %44, %46 : vector<16x32xf32>
    %cst_18 = arith.constant dense<0.000000e+00> : vector<16xf32>
    %48 = vector.multi_reduction <add>, %47, %cst_18 [1] : vector<16x32xf32> to vector<16xf32>
    %49 = vector.shape_cast %48 : vector<16xf32> to vector<16x1xf32>
    %cst_19 = arith.constant 3.200000e+01 : f32
    %50 = vector.broadcast %cst_19 : f32 to vector<16x1xf32>
    %51 = arith.divf %49, %50 : vector<16x1xf32>
    %52 = vector.broadcast %42 : vector<16x1xf32> to vector<16x32xf32>
    %53 = arith.subf %36, %52 : vector<16x32xf32>
    %cst_20 = arith.constant 9.99999974E-6 : f32
    %54 = vector.broadcast %cst_20 : f32 to vector<16x1xf32>
    %55 = arith.addf %51, %54 : vector<16x1xf32>
    %56 = math.rsqrt %55 : vector<16x1xf32>
    %57 = vector.broadcast %56 : vector<16x1xf32> to vector<16x32xf32>
    %58 = arith.mulf %53, %57 : vector<16x32xf32>
    %59 = vector.broadcast %37 : vector<1x32xf32> to vector<16x32xf32>
    %60 = arith.mulf %58, %59 : vector<16x32xf32>
    %61 = vector.broadcast %38 : vector<1x32xf32> to vector<16x32xf32>
    %62 = arith.addf %60, %61 : vector<16x32xf32>
    %c128 = arith.constant 128 : index
    %c0_21 = arith.constant 0 : index
    %63 = vector.load %arg1[%c128, %c0_21] : memref<464x128xf32, #tpu.memory_space<vmem>>, vector<32x64xf32>
    %cst_22 = arith.constant dense<0.000000e+00> : vector<16x64xf32>
    %64 = tpu.matmul %62, %63, %cst_22 {dimension_numbers = #tpu.dot_dimension_numbers<[1], [0], [0], [1], [0, 0, 1, 1], [], []>} : vector<16x32xf32>, vector<32x64xf32>, vector<16x64xf32> -> vector<16x64xf32>
    %c226 = arith.constant 226 : index
    %c0_23 = arith.constant 0 : index
    %65 = vector.load %arg1[%c226, %c0_23] : memref<464x128xf32, #tpu.memory_space<vmem>>, vector<1x64xf32>
    %66 = vector.broadcast %65 : vector<1x64xf32> to vector<16x64xf32>
    %67 = arith.addf %64, %66 : vector<16x64xf32>
    %cst_24 = arith.constant 0.000000e+00 : f32
    %68 = vector.broadcast %cst_24 : f32 to vector<16x64xf32>
    %69 = arith.maximumf %67, %68 : vector<16x64xf32>
    %c160 = arith.constant 160 : index
    %c0_25 = arith.constant 0 : index
    %70 = vector.load %arg1[%c160, %c0_25] : memref<464x128xf32, #tpu.memory_space<vmem>>, vector<64x32xf32>
    %cst_26 = arith.constant dense<0.000000e+00> : vector<16x32xf32>
    %71 = tpu.matmul %69, %70, %cst_26 {dimension_numbers = #tpu.dot_dimension_numbers<[1], [0], [0], [1], [0, 0, 1, 1], [], []>} : vector<16x64xf32>, vector<64x32xf32>, vector<16x32xf32> -> vector<16x32xf32>
    %c227 = arith.constant 227 : index
    %c0_27 = arith.constant 0 : index
    %72 = vector.load %arg1[%c227, %c0_27] : memref<464x128xf32, #tpu.memory_space<vmem>>, vector<1x32xf32>
    %73 = vector.broadcast %72 : vector<1x32xf32> to vector<16x32xf32>
    %74 = arith.addf %71, %73 : vector<16x32xf32>
    %75 = arith.addf %62, %74 : vector<16x32xf32>
    %c230 = arith.constant 230 : index
    %c0_28 = arith.constant 0 : index
    %76 = vector.load %arg1[%c230, %c0_28] : memref<464x128xf32, #tpu.memory_space<vmem>>, vector<1x32xf32>
    %c231 = arith.constant 231 : index
    %c0_29 = arith.constant 0 : index
    %77 = vector.load %arg1[%c231, %c0_29] : memref<464x128xf32, #tpu.memory_space<vmem>>, vector<1x32xf32>
    %cst_30 = arith.constant dense<0.000000e+00> : vector<16xf32>
    %78 = vector.multi_reduction <add>, %75, %cst_30 [1] : vector<16x32xf32> to vector<16xf32>
    %79 = vector.shape_cast %78 : vector<16xf32> to vector<16x1xf32>
    %cst_31 = arith.constant 3.200000e+01 : f32
    %80 = vector.broadcast %cst_31 : f32 to vector<16x1xf32>
    %81 = arith.divf %79, %80 : vector<16x1xf32>
    %82 = vector.broadcast %81 : vector<16x1xf32> to vector<16x32xf32>
    %83 = arith.subf %75, %82 : vector<16x32xf32>
    %84 = vector.broadcast %81 : vector<16x1xf32> to vector<16x32xf32>
    %85 = arith.subf %75, %84 : vector<16x32xf32>
    %86 = arith.mulf %83, %85 : vector<16x32xf32>
    %cst_32 = arith.constant dense<0.000000e+00> : vector<16xf32>
    %87 = vector.multi_reduction <add>, %86, %cst_32 [1] : vector<16x32xf32> to vector<16xf32>
    %88 = vector.shape_cast %87 : vector<16xf32> to vector<16x1xf32>
    %cst_33 = arith.constant 3.200000e+01 : f32
    %89 = vector.broadcast %cst_33 : f32 to vector<16x1xf32>
    %90 = arith.divf %88, %89 : vector<16x1xf32>
    %91 = vector.broadcast %81 : vector<16x1xf32> to vector<16x32xf32>
    %92 = arith.subf %75, %91 : vector<16x32xf32>
    %cst_34 = arith.constant 9.99999974E-6 : f32
    %93 = vector.broadcast %cst_34 : f32 to vector<16x1xf32>
    %94 = arith.addf %90, %93 : vector<16x1xf32>
    %95 = math.rsqrt %94 : vector<16x1xf32>
    %96 = vector.broadcast %95 : vector<16x1xf32> to vector<16x32xf32>
    %97 = arith.mulf %92, %96 : vector<16x32xf32>
    %98 = vector.broadcast %76 : vector<1x32xf32> to vector<16x32xf32>
    %99 = arith.mulf %97, %98 : vector<16x32xf32>
    %100 = vector.broadcast %77 : vector<1x32xf32> to vector<16x32xf32>
    %101 = arith.addf %99, %100 : vector<16x32xf32>
    %c232 = arith.constant 232 : index
    %c0_35 = arith.constant 0 : index
    %102 = vector.load %arg1[%c232, %c0_35] : memref<464x128xf32, #tpu.memory_space<vmem>>, vector<32x96xf32>
    %cst_36 = arith.constant dense<0.000000e+00> : vector<16x96xf32>
    %103 = tpu.matmul %101, %102, %cst_36 {dimension_numbers = #tpu.dot_dimension_numbers<[1], [0], [0], [1], [0, 0, 1, 1], [], []>} : vector<16x32xf32>, vector<32x96xf32>, vector<16x96xf32> -> vector<16x96xf32>
    %c392 = arith.constant 392 : index
    %c0_37 = arith.constant 0 : index
    %104 = vector.load %arg1[%c392, %c0_37] : memref<464x128xf32, #tpu.memory_space<vmem>>, vector<1x96xf32>
    %105 = vector.broadcast %104 : vector<1x96xf32> to vector<16x96xf32>
    %106 = arith.addf %103, %105 : vector<16x96xf32>
    %107 = vector.extract_strided_slice %106 {offsets = [0, 0], sizes = [16, 32], strides = [1, 1]} : vector<16x96xf32> to vector<16x32xf32>
    %108 = vector.extract_strided_slice %106 {offsets = [0, 32], sizes = [16, 32], strides = [1, 1]} : vector<16x96xf32> to vector<16x32xf32>
    %109 = vector.extract_strided_slice %106 {offsets = [0, 64], sizes = [16, 32], strides = [1, 1]} : vector<16x96xf32> to vector<16x32xf32>
    %110 = arith.mulf %107, %108 : vector<16x32xf32>
    %cst_38 = arith.constant dense<0.000000e+00> : vector<16x32xf32>
    %111 = tpu.matmul %110, %5, %cst_38 {dimension_numbers = #tpu.dot_dimension_numbers<[1], [0], [0], [1], [0, 0, 1, 1], [], []>} : vector<16x32xf32>, vector<32x32xf32>, vector<16x32xf32> -> vector<16x32xf32>
    %c8_i32_39 = arith.constant 8 : i32
    %112 = tpu.dynamic_rotate %108 by %c8_i32_39 dim 0 : vector<16x32xf32>, i32 -> vector<16x32xf32>
    %113 = arith.mulf %107, %112 : vector<16x32xf32>
    %cst_40 = arith.constant dense<0.000000e+00> : vector<16x32xf32>
    %114 = tpu.matmul %113, %5, %cst_40 {dimension_numbers = #tpu.dot_dimension_numbers<[1], [0], [0], [1], [0, 0, 1, 1], [], []>} : vector<16x32xf32>, vector<32x32xf32>, vector<16x32xf32> -> vector<16x32xf32>
    %115 = arith.maximumf %111, %114 : vector<16x32xf32>
    %116 = arith.subf %111, %115 : vector<16x32xf32>
    %117 = math.exp %116 : vector<16x32xf32>
    %118 = arith.subf %114, %115 : vector<16x32xf32>
    %119 = math.exp %118 : vector<16x32xf32>
    %120 = arith.addf %117, %119 : vector<16x32xf32>
    %121 = arith.mulf %117, %109 : vector<16x32xf32>
    %c8_i32_41 = arith.constant 8 : i32
    %122 = tpu.dynamic_rotate %109 by %c8_i32_41 dim 0 : vector<16x32xf32>, i32 -> vector<16x32xf32>
    %123 = arith.mulf %119, %122 : vector<16x32xf32>
    %124 = arith.addf %121, %123 : vector<16x32xf32>
    %125 = tpu.reciprocal %120 {approx = true} : vector<16x32xf32> -> vector<16x32xf32>
    %126 = arith.mulf %124, %125 : vector<16x32xf32>
    %c264 = arith.constant 264 : index
    %c0_42 = arith.constant 0 : index
    %127 = vector.load %arg1[%c264, %c0_42] : memref<464x128xf32, #tpu.memory_space<vmem>>, vector<32x32xf32>
    %cst_43 = arith.constant dense<0.000000e+00> : vector<16x32xf32>
    %128 = tpu.matmul %126, %127, %cst_43 {dimension_numbers = #tpu.dot_dimension_numbers<[1], [0], [0], [1], [0, 0, 1, 1], [], []>} : vector<16x32xf32>, vector<32x32xf32>, vector<16x32xf32> -> vector<16x32xf32>
    %c393 = arith.constant 393 : index
    %c0_44 = arith.constant 0 : index
    %129 = vector.load %arg1[%c393, %c0_44] : memref<464x128xf32, #tpu.memory_space<vmem>>, vector<1x32xf32>
    %130 = vector.broadcast %129 : vector<1x32xf32> to vector<16x32xf32>
    %131 = arith.addf %128, %130 : vector<16x32xf32>
    %132 = arith.addf %101, %131 : vector<16x32xf32>
    %c396 = arith.constant 396 : index
    %c0_45 = arith.constant 0 : index
    %133 = vector.load %arg1[%c396, %c0_45] : memref<464x128xf32, #tpu.memory_space<vmem>>, vector<1x32xf32>
    %c397 = arith.constant 397 : index
    %c0_46 = arith.constant 0 : index
    %134 = vector.load %arg1[%c397, %c0_46] : memref<464x128xf32, #tpu.memory_space<vmem>>, vector<1x32xf32>
    %cst_47 = arith.constant dense<0.000000e+00> : vector<16xf32>
    %135 = vector.multi_reduction <add>, %132, %cst_47 [1] : vector<16x32xf32> to vector<16xf32>
    %136 = vector.shape_cast %135 : vector<16xf32> to vector<16x1xf32>
    %cst_48 = arith.constant 3.200000e+01 : f32
    %137 = vector.broadcast %cst_48 : f32 to vector<16x1xf32>
    %138 = arith.divf %136, %137 : vector<16x1xf32>
    %139 = vector.broadcast %138 : vector<16x1xf32> to vector<16x32xf32>
    %140 = arith.subf %132, %139 : vector<16x32xf32>
    %141 = vector.broadcast %138 : vector<16x1xf32> to vector<16x32xf32>
    %142 = arith.subf %132, %141 : vector<16x32xf32>
    %143 = arith.mulf %140, %142 : vector<16x32xf32>
    %cst_49 = arith.constant dense<0.000000e+00> : vector<16xf32>
    %144 = vector.multi_reduction <add>, %143, %cst_49 [1] : vector<16x32xf32> to vector<16xf32>
    %145 = vector.shape_cast %144 : vector<16xf32> to vector<16x1xf32>
    %cst_50 = arith.constant 3.200000e+01 : f32
    %146 = vector.broadcast %cst_50 : f32 to vector<16x1xf32>
    %147 = arith.divf %145, %146 : vector<16x1xf32>
    %148 = vector.broadcast %138 : vector<16x1xf32> to vector<16x32xf32>
    %149 = arith.subf %132, %148 : vector<16x32xf32>
    %cst_51 = arith.constant 9.99999974E-6 : f32
    %150 = vector.broadcast %cst_51 : f32 to vector<16x1xf32>
    %151 = arith.addf %147, %150 : vector<16x1xf32>
    %152 = math.rsqrt %151 : vector<16x1xf32>
    %153 = vector.broadcast %152 : vector<16x1xf32> to vector<16x32xf32>
    %154 = arith.mulf %149, %153 : vector<16x32xf32>
    %155 = vector.broadcast %133 : vector<1x32xf32> to vector<16x32xf32>
    %156 = arith.mulf %154, %155 : vector<16x32xf32>
    %157 = vector.broadcast %134 : vector<1x32xf32> to vector<16x32xf32>
    %158 = arith.addf %156, %157 : vector<16x32xf32>
    %c296 = arith.constant 296 : index
    %c0_52 = arith.constant 0 : index
    %159 = vector.load %arg1[%c296, %c0_52] : memref<464x128xf32, #tpu.memory_space<vmem>>, vector<32x64xf32>
    %cst_53 = arith.constant dense<0.000000e+00> : vector<16x64xf32>
    %160 = tpu.matmul %158, %159, %cst_53 {dimension_numbers = #tpu.dot_dimension_numbers<[1], [0], [0], [1], [0, 0, 1, 1], [], []>} : vector<16x32xf32>, vector<32x64xf32>, vector<16x64xf32> -> vector<16x64xf32>
    %c394 = arith.constant 394 : index
    %c0_54 = arith.constant 0 : index
    %161 = vector.load %arg1[%c394, %c0_54] : memref<464x128xf32, #tpu.memory_space<vmem>>, vector<1x64xf32>
    %162 = vector.broadcast %161 : vector<1x64xf32> to vector<16x64xf32>
    %163 = arith.addf %160, %162 : vector<16x64xf32>
    %cst_55 = arith.constant 0.000000e+00 : f32
    %164 = vector.broadcast %cst_55 : f32 to vector<16x64xf32>
    %165 = arith.maximumf %163, %164 : vector<16x64xf32>
    %c328 = arith.constant 328 : index
    %c0_56 = arith.constant 0 : index
    %166 = vector.load %arg1[%c328, %c0_56] : memref<464x128xf32, #tpu.memory_space<vmem>>, vector<64x32xf32>
    %cst_57 = arith.constant dense<0.000000e+00> : vector<16x32xf32>
    %167 = tpu.matmul %165, %166, %cst_57 {dimension_numbers = #tpu.dot_dimension_numbers<[1], [0], [0], [1], [0, 0, 1, 1], [], []>} : vector<16x64xf32>, vector<64x32xf32>, vector<16x32xf32> -> vector<16x32xf32>
    %c395 = arith.constant 395 : index
    %c0_58 = arith.constant 0 : index
    %168 = vector.load %arg1[%c395, %c0_58] : memref<464x128xf32, #tpu.memory_space<vmem>>, vector<1x32xf32>
    %169 = vector.broadcast %168 : vector<1x32xf32> to vector<16x32xf32>
    %170 = arith.addf %167, %169 : vector<16x32xf32>
    %171 = arith.addf %158, %170 : vector<16x32xf32>
    %c398 = arith.constant 398 : index
    %c0_59 = arith.constant 0 : index
    %172 = vector.load %arg1[%c398, %c0_59] : memref<464x128xf32, #tpu.memory_space<vmem>>, vector<1x32xf32>
    %c399 = arith.constant 399 : index
    %c0_60 = arith.constant 0 : index
    %173 = vector.load %arg1[%c399, %c0_60] : memref<464x128xf32, #tpu.memory_space<vmem>>, vector<1x32xf32>
    %cst_61 = arith.constant dense<0.000000e+00> : vector<16xf32>
    %174 = vector.multi_reduction <add>, %171, %cst_61 [1] : vector<16x32xf32> to vector<16xf32>
    %175 = vector.shape_cast %174 : vector<16xf32> to vector<16x1xf32>
    %cst_62 = arith.constant 3.200000e+01 : f32
    %176 = vector.broadcast %cst_62 : f32 to vector<16x1xf32>
    %177 = arith.divf %175, %176 : vector<16x1xf32>
    %178 = vector.broadcast %177 : vector<16x1xf32> to vector<16x32xf32>
    %179 = arith.subf %171, %178 : vector<16x32xf32>
    %180 = vector.broadcast %177 : vector<16x1xf32> to vector<16x32xf32>
    %181 = arith.subf %171, %180 : vector<16x32xf32>
    %182 = arith.mulf %179, %181 : vector<16x32xf32>
    %cst_63 = arith.constant dense<0.000000e+00> : vector<16xf32>
    %183 = vector.multi_reduction <add>, %182, %cst_63 [1] : vector<16x32xf32> to vector<16xf32>
    %184 = vector.shape_cast %183 : vector<16xf32> to vector<16x1xf32>
    %cst_64 = arith.constant 3.200000e+01 : f32
    %185 = vector.broadcast %cst_64 : f32 to vector<16x1xf32>
    %186 = arith.divf %184, %185 : vector<16x1xf32>
    %187 = vector.broadcast %177 : vector<16x1xf32> to vector<16x32xf32>
    %188 = arith.subf %171, %187 : vector<16x32xf32>
    %cst_65 = arith.constant 9.99999974E-6 : f32
    %189 = vector.broadcast %cst_65 : f32 to vector<16x1xf32>
    %190 = arith.addf %186, %189 : vector<16x1xf32>
    %191 = math.rsqrt %190 : vector<16x1xf32>
    %192 = vector.broadcast %191 : vector<16x1xf32> to vector<16x32xf32>
    %193 = arith.mulf %188, %192 : vector<16x32xf32>
    %194 = vector.broadcast %172 : vector<1x32xf32> to vector<16x32xf32>
    %195 = arith.mulf %193, %194 : vector<16x32xf32>
    %196 = vector.broadcast %173 : vector<1x32xf32> to vector<16x32xf32>
    %197 = arith.addf %195, %196 : vector<16x32xf32>
    %c400 = arith.constant 400 : index
    %c0_66 = arith.constant 0 : index
    %198 = vector.load %arg1[%c400, %c0_66] : memref<464x128xf32, #tpu.memory_space<vmem>>, vector<8x16xf32>
    %cst_67 = arith.constant dense<0.000000e+00> : vector<8x32xf32>
    %199 = tpu.matmul %198, %197, %cst_67 {dimension_numbers = #tpu.dot_dimension_numbers<[1], [0], [0], [1], [0, 0, 1, 1], [], []>} : vector<8x16xf32>, vector<16x32xf32>, vector<8x32xf32> -> vector<8x32xf32>
    %c408 = arith.constant 408 : index
    %c0_68 = arith.constant 0 : index
    %200 = vector.load %arg1[%c408, %c0_68] : memref<464x128xf32, #tpu.memory_space<vmem>>, vector<32x16xf32>
    %cst_69 = arith.constant dense<0.000000e+00> : vector<8x16xf32>
    %201 = tpu.matmul %199, %200, %cst_69 {dimension_numbers = #tpu.dot_dimension_numbers<[1], [0], [0], [1], [0, 0, 1, 1], [], []>} : vector<8x32xf32>, vector<32x16xf32>, vector<8x16xf32> -> vector<8x16xf32>
    %c440 = arith.constant 440 : index
    %c0_70 = arith.constant 0 : index
    %202 = vector.load %arg1[%c440, %c0_70] : memref<464x128xf32, #tpu.memory_space<vmem>>, vector<1x16xf32>
    %203 = vector.broadcast %202 : vector<1x16xf32> to vector<8x16xf32>
    %204 = arith.addf %201, %203 : vector<8x16xf32>
    %cst_71 = arith.constant 0.000000e+00 : f32
    %205 = vector.broadcast %cst_71 : f32 to vector<8x16xf32>
    %206 = arith.maximumf %204, %205 : vector<8x16xf32>
    %c448 = arith.constant 448 : index
    %c0_72 = arith.constant 0 : index
    %207 = vector.load %arg1[%c448, %c0_72] : memref<464x128xf32, #tpu.memory_space<vmem>>, vector<16x128xf32>
    %cst_73 = arith.constant dense<0.000000e+00> : vector<8x128xf32>
    %208 = tpu.matmul %206, %207, %cst_73 {dimension_numbers = #tpu.dot_dimension_numbers<[1], [0], [0], [1], [0, 0, 1, 1], [], []>} : vector<8x16xf32>, vector<16x128xf32>, vector<8x128xf32> -> vector<8x128xf32>
    %c441 = arith.constant 441 : index
    %c0_74 = arith.constant 0 : index
    %209 = vector.load %arg1[%c441, %c0_74] : memref<464x128xf32, #tpu.memory_space<vmem>>, vector<1x128xf32>
    %210 = vector.broadcast %209 : vector<1x128xf32> to vector<8x128xf32>
    %211 = arith.addf %208, %210 : vector<8x128xf32>
    %c0_75 = arith.constant 0 : index
    %c0_76 = arith.constant 0 : index
    %212 = vector.load %arg2[%c0_75, %c0_76] : memref<8x128xf32, #tpu.memory_space<vmem>>, vector<8x128xf32>
    tpu.vector_store %arg2[%c0_75, %c0_76], %211 {strides = array<i32>} : memref<8x128xf32, #tpu.memory_space<vmem>>, vector<8x128xf32>,
    return
  }
}

</mosaic_0001>

<bundles_post_ra>
// kernel: transformer_classifier_forward.1
= control target key start
LH: loop header
LB: loop body
LE: loop exit
PB: predicated region body
PF: predicated region fallthrough
CT: control target
= control target key end

     0   :  { %7 = vsyncpa [#allocation3], 0  ;;  %s2380_s0 = inlined_call_operand.hbm [shape: f32[16,16], index: 0, kind: input, shape index: {}]   ;;  %s2381_s1 = inlined_call_operand.hbm [shape: f32[464,128], index: 1, kind: input, shape index: {}]   ;;  %s2382_s2 = inlined_call_operand.vmem [shape: f32[8,128], index: 2, kind: output, shape index: {}]  }
   0x1   :  { %8 = vsyncpa [#allocation5], 0  ;;  %s2237_s9 = smov [#allocation2]   ;;  %s2189_s13 = scalar_lea.hbm %s2380_s0, 256 }
   0x2   :  { %s14_s10 = sshll.u32 %s2237_s9, 4  ;;  %p2190_p0 = scmp.ne.s32.totalorder %s2380_s0, %s2189_s13  ;;  %s15_s10 = int_to_ptr.vmem [resolvable:$true] %s14_s10 }
   0x3   :  { %p2193_p1 = scmp.lt.u32.totalorder %s2189_s13, %s2380_s0 }
   0x5   :  { %p2195_p2 = pnand %p2193_p1, %p2190_p0 }
   0x7   :  { %2198 = shalt.err (!%p2195_p2)
}
   0x8   :  { %s2199_s18 = scalar_lea.vmem %s15_s10, 256  ;;  %p2204_p4 = scmp.lt.s32.totalorder %s15_s10, %s15_s10 }
   0x9   :  { %p2200_p3 = scmp.ne.s32.totalorder %s15_s10, %s2199_s18  ;;  %p2205_p5 = scmp.lt.s32.totalorder %s2199_s18, %s2199_s18 }
   0xb   :  { %p2206_p6 = por %p2205_p5, %p2204_p4 }
   0xd   :  { %p2207_p7 = pnand %p2206_p6, %p2200_p3 }
   0xf   :  { %2210 = shalt.err (!%p2207_p7)
}
  0x10   :  { %s2238_s19 = smov 128   ;;  %s2239_s20 = smov 8  }
  0x11   :  { %20 = dma.hbm_to_vmem [thread:$0]  %s2380_s0, 256, %s15_s10, [#allocation3], %s2238_s19, %s2238_s19, %s2239_s20  }
  0x12   :  { %s2240_s23 = smov [#allocation4]   ;;  %s2211_s27 = scalar_lea.hbm %s2381_s1, 7424 }
  0x13   :  { %s26_s24 = sshll.u32 %s2240_s23, 4  ;;  %p2212_p8 = scmp.ne.s32.totalorder %s2381_s1, %s2211_s27  ;;  %s27_s24 = int_to_ptr.vmem [resolvable:$true] %s26_s24 }
  0x14   :  { %p2215_p9 = scmp.lt.u32.totalorder %s2211_s27, %s2381_s1 }
  0x16   :  { %p2217_p10 = pnand %p2215_p9, %p2212_p8 }
  0x18   :  { %2220 = shalt.err (!%p2217_p10)
}
  0x19   :  { %s2221_s4 = scalar_lea.vmem %s27_s24, 7424  ;;  %p2226_p12 = scmp.lt.s32.totalorder %s27_s24, %s27_s24 }
  0x1a   :  { %p2222_p11 = scmp.ne.s32.totalorder %s27_s24, %s2221_s4  ;;  %p2227_p13 = scmp.lt.s32.totalorder %s2221_s4, %s2221_s4 }
  0x1c   :  { %p2228_p0 = por %p2227_p13, %p2226_p12 }
  0x1e   :  { %p2229_p1 = pnand %p2228_p0, %p2222_p11 }
  0x20   :  { %2232 = shalt.err (!%p2229_p1)
}
  0x21   :  { %32 = dma.hbm_to_vmem [thread:$0]  %s2381_s1, 7424, %s27_s24, [#allocation5], %s2238_s19, %s2238_s19, %s2239_s20  }
  0x22   :  { %2233 = dma.done.wait [#allocation3], 256  }
  0x23   :  { %2234 = vsyncadd [#allocation3], 4294967040 }
  0x24   :  { %2235 = dma.done.wait [#allocation5], 7424  }
  0x25   :  { %2236 = vsyncadd [#allocation5], 4294959872  ;;  %vm45_vm0 = vcmask 130048   ;;  %v41_v0 = vld [vmem:[#allocation4] sm:$0xff]  ;;  %v42_v1 = vld [vmem:[#allocation4 + $0x8] sm:$0xff]  ;;  %vm140_vm1 = vcmask 261120  }
  0x26   :  { %v39_v2 = vld [vmem:[#allocation2] sm:$0xff]  ;;  %v2012_v3 = vpack.c.bf16 %v42_v1, %v41_v0  ;;  %v131_v4 = vld [vmem:[#allocation4 + $0x40] sm:$0xff]  ;;  %v132_v5 = vld [vmem:[#allocation4 + $0x48] sm:$0xff]  ;;  %s2241_s1 = smov 64   ;;  %s2242_s6 = smov 96   ;;  %vm666_vm2 = vcmask 523264  }
  0x27   :  { %1836 = vmatprep.mubr.msk.f32.mxu0 %vm45_vm0, %v39_v2  ;;  %v2016_v6 = vpack.c.bf16 %v132_v5, %v131_v4  ;;  %v40_v7 = vld [vmem:[#allocation2 + $0x8] sm:$0xff]  ;;  %v133_v8 = vld [vmem:[#allocation4 + $0x50] sm:$0xff]  ;;  %v127_v17 = vld [vmem:[#allocation4 + $0x20] sm:$0xff]  ;;  %vm2244_vm3 = vmmov 0  }
  0x28   :  { %2013 = vmatprep.subr.bf16.mxu0 %v2012_v3  ;;  %v134_v9 = vld [vmem:[#allocation4 + $0x58] sm:$0xff]  ;;  %v43_v11 = vld [vmem:[#allocation4 + $0x10] sm:$0xff]  ;;  %v128_v18 = vld [vmem:[#allocation4 + $0x28] sm:$0xff] }
  0x29   :  { %2015 = vmatpush3.bf16.msra.mxu0 %v2012_v3  ;;  %2017 = vmatprep.subr.bf16.mxu1 %v2016_v6  ;;  %v2020_v10 = vpack.c.bf16 %v134_v9, %v133_v8  ;;  %v44_v12 = vld [vmem:[#allocation4 + $0x18] sm:$0xff]  ;;  %v2295_v19 = vpack.c.bf16 %v128_v18, %v127_v17  ;;  %v129_v20 = vld [vmem:[#allocation4 + $0x30] sm:$0xff]  ;;  %v1692_v23 = vld [vmem:[#allocation4 + $0xe0] ss:$0 sm:$0xff] }
  0x2a   :  { %2019 = vmatpush3.bf16.msra.mxu1 %v2016_v6  ;;  %v130_v21 = vld [vmem:[#allocation4 + $0x38] sm:$0xff]  ;;  %v428_v34 = vld [vmem:[#allocation4 + $0x60] sm:$0xff]  ;;  %v429_v35 = vld [vmem:[#allocation4 + $0x68] sm:$0xff] }
  0x2b   :  { %2021 = vmatprep.subr.bf16.mxu1 %v2020_v10  ;;  %2025 = vmatprep.subr.bf16.mxu0 %v2295_v19  ;;  %v2301_v22 = vpack.c.bf16 %v130_v21, %v129_v20  ;;  %v430_v36 = vld [vmem:[#allocation4 + $0x70] sm:$0xff]  ;;  %v2040_v37 = vpack.c.bf16 %v429_v35, %v428_v34  ;;  %v431_v38 = vld [vmem:[#allocation4 + $0x78] sm:$0xff]  ;;  %v1699_v8 = vld [vmem:[#allocation4 + $0xe1] ss:$0 sm:$0xff] }
  0x2c   :  { %1837 = vmatmul.mubr.msk.f32.vlgmr.msra.gmra.mrb[0].mxu0 %vm45_vm0, %v40_v7  ;;  %v2044_v39 = vpack.c.bf16 %v431_v38, %v430_v36  ;;  %v653_v35 = vld [vmem:[#allocation4 + $0xa0] sm:$0xff]  ;;  %v654_v36 = vld [vmem:[#allocation4 + $0xa8] sm:$0xff] }
  0x2d   :  { %2027 = vmatpush3.bf16.msra.mxu0 %v2295_v19  ;;  %v2056_v38 = vpack.c.bf16 %v654_v36, %v653_v35 }
  0x2e   :  { %2023 = vmatpush3.bf16.msra.mxu1 %v2020_v10  ;;  %2029 = vmatprep.subr.bf16.mxu0 %v2301_v22 }
  0x2f   :  { %2033 = vmatprep.subr.bf16.mxu1 %v2295_v19 }
  0x31   :  { %2031 = vmatpush3.bf16.msra.mxu0 %v2301_v22 }
  0x32   :  { %2041 = vmatprep.subr.bf16.mxu0 %v2040_v37 }
  0xff   :  { %v1838_v13 = vpop.f32.mrb[0].mxu0 }
 0x100   :  { %v118_v14 = vpop.f32.mrb[1].mxu0  ;;  %v2289_v16 = vadd.f32 %v1838_v13, %v44_v12 }
 0x101   :  { %v2287_v15 = vadd.f32 %v118_v14, %v43_v11 }
 0x103   :  { %1847 = vmatprep.mubr.msk.f32.mxu1 %vm140_vm1, %v2287_v15 }
 0x104   :  { %1848 = vmatmul.mubr.msk.f32.vlgmr.msra.gmra.mrb[0].mxu1 %vm140_vm1, %v2289_v16 }
 0x105   :  { %2035 = vmatpush3.bf16.msra.mxu1 %v2295_v19 }
 0x106   :  { %2037 = vmatprep.subr.bf16.mxu1 %v2301_v22 }
 0x109   :  { %2039 = vmatpush3.bf16.msra.mxu1 %v2301_v22 }
 0x1d7   :  { %v1849_v24 = vpop.f32.mrb[0].mxu1 }
 0x1d8   :  { %v213_v25 = vpop.f32.mrb[1].mxu1  ;;  %v219_v27 = vadd.f32 %v1849_v24, %v1692_v23 }
 0x1d9   :  { %v214_v26 = vadd.f32 %v1692_v23, %v213_v25 }
 0x1db   :  { %412 = vrot.lane.b32.xlu1 %v214_v26, %s2241_s1  ;;  %224 = vrot.lane.b32.xlu0 %v214_v26, %s2242_s6 }
 0x1df   :  { %414 = vrot.lane.b32.xlu1 %v219_v27, %s2241_s1  ;;  %226 = vrot.lane.b32.xlu0 %v219_v27, %s2242_s6 }
 0x24d   :  { %v225_v28 = vpop.permute.xlu0 %224  ;;  %v413_v54 = vpop.permute.xlu1 %412 }
 0x24e   :  { %v230_v29 = vmul.f32 %v225_v28, %v214_v26  ;;  %v314_v33 = vmul.f32 %v225_v28, %v219_v27 }
 0x250   :  { %1858 = vmatprep.mubr.msk.f32.mxu0 %vm140_vm1, %v230_v29 }
 0x251   :  { %v227_v30 = vpop.permute.xlu0 %226  ;;  %v415_v56 = vpop.permute.xlu1 %414 }
 0x252   :  { %v231_v31 = vmul.f32 %v227_v30, %v219_v27  ;;  %v313_v32 = vmul.f32 %v227_v30, %v214_v26  ;;  %v562_v30 = vld [vmem:[#allocation4 + $0x88] sm:$0xff] }
 0x254   :  { %1859 = vmatmul.mubr.msk.f32.vlgmr.msra.gmra.mrb[2].mxu0 %vm140_vm1, %v231_v31  ;;  %1869 = vmatprep.mubr.msk.f32.mxu1 %vm140_vm1, %v313_v32  ;;  %v563_v32 = vld [vmem:[#allocation4 + $0x90] sm:$0xff] }
 0x255   :  { %1870 = vmatmul.mubr.msk.f32.vlgmr.msra.gmra.mrb[2].mxu1 %vm140_vm1, %v314_v33  ;;  %2043 = vmatpush3.bf16.msra.mxu0 %v2040_v37  ;;  %v564_v33 = vld [vmem:[#allocation4 + $0x98] sm:$0xff]  ;;  %v655_v37 = vld [vmem:[#allocation4 + $0xb0] sm:$0xff] }
 0x256   :  { %2045 = vmatprep.subr.bf16.mxu0 %v2044_v39  ;;  %v2052_v34 = vpack.c.bf16 %v564_v33, %v563_v32 }
 0x259   :  { %2047 = vmatpush3.bf16.msra.mxu0 %v2044_v39  ;;  %v656_v39 = vld [vmem:[#allocation4 + $0xb8] sm:$0xff] }
 0x25a   :  { %2057 = vmatprep.subr.bf16.mxu0 %v2056_v38 }
 0x327   :  { %v1860_v40 = vpop.f32.mrb[2].mxu0 }
 0x328   :  { %v304_v41 = vpop.f32.mrb[3].mxu0  ;;  %v1871_v42 = vpop.f32.mrb[2].mxu1 }
 0x329   :  { %v397_v43 = vmax.f32 %v1860_v40, %v1871_v42  ;;  %v387_v44 = vpop.f32.mrb[3].mxu1 }
 0x32a   :  { %v396_v45 = vmax.f32 %v304_v41, %v387_v44 }
 0x32b   :  { %v399_v46 = vsub.f32 %v1860_v40, %v397_v43  ;;  %v405_v47 = vsub.f32 %v1871_v42, %v397_v43  ;;  %v2060_v40 = vpack.c.bf16 %v656_v39, %v655_v37  ;;  %v658_v42 = vld [vmem:[#allocation4 + $0xc8] sm:$0xff] }
 0x32c   :  { %v398_v48 = vsub.f32 %v304_v41, %v396_v45  ;;  %v404_v49 = vsub.f32 %v387_v44, %v396_v45  ;;  %v657_v41 = vld [vmem:[#allocation4 + $0xc0] sm:$0xff] }
 0x32d   :  { %v402_v50 = vmul.f32 1.442695, %v399_v46  ;;  %v408_v51 = vmul.f32 1.442695, %v405_v47  ;;  %v2064_v43 = vpack.c.bf16 %v658_v42, %v657_v41 }
 0x32e   :  { %v400_v52 = vmul.f32 1.442695, %v398_v48  ;;  %v406_v53 = vmul.f32 1.442695, %v404_v49 }
 0x32f   :  { %2149 = vpow2.f32 %v402_v50 }
 0x330   :  { %2151 = vpow2.f32 %v408_v51  ;;  %v1702_v51 = vld [vmem:[#allocation4 + $0xe4] ss:$0 sm:$0xff] }
 0x331   :  { %2153 = vpow2.f32 %v400_v52 }
 0x332   :  { %2155 = vpow2.f32 %v406_v53  ;;  %v1703_v53 = vld [vmem:[#allocation4 + $0xe5] ss:$0 sm:$0xff] }
 0x339   :  { %v2150_v55 = vpop.eup %2149 }
 0x33a   :  { %v2152_v57 = vpop.eup %2151  ;;  %v419_v58 = vmul.f32 %v2150_v55, %v415_v56 }
 0x33b   :  { %v2154_v59 = vpop.eup %2153  ;;  %v411_v60 = vadd.f32 %v2152_v57, %v2150_v55  ;;  %v421_v61 = vmul.f32 %v2152_v57, %v413_v54 }
 0x33c   :  { %v2156_v62 = vpop.eup %2155  ;;  %v418_v63 = vmul.f32 %v2154_v59, %v413_v54 }
 0x33d   :  { %2157 = vrcp.f32 %v411_v60  ;;  %v410_v0 = vadd.f32 %v2156_v62, %v2154_v59  ;;  %v420_v1 = vmul.f32 %v2156_v62, %v415_v56  ;;  %v423_v2 = vadd.f32 %v421_v61, %v419_v58  ;;  %v659_v60 = vld [vmem:[#allocation4 + $0xd0] sm:$0xff]  ;;  %v660_v61 = vld [vmem:[#allocation4 + $0xd8] sm:$0xff] }
 0x33e   :  { %v2068_v62 = vpack.c.bf16 %v660_v61, %v659_v60  ;;  %v1088_v60 = vld [vmem:[#allocation4 + $0x118] sm:$0xff] }
 0x33f   :  { %2159 = vrcp.f32 %v410_v0  ;;  %v422_v3 = vadd.f32 %v420_v1, %v418_v63  ;;  %v1704_v63 = vld [vmem:[#allocation4 + $0xe2] ss:$0 sm:$0xff] }
 0x347   :  { %v2158_v4 = vpop.eup %2157 }
 0x348   :  { %v427_v5 = vmul.f32 %v2158_v4, %v423_v2 }
 0x349   :  { %v2160_v6 = vpop.eup %2159 }
 0x34a   :  { %v426_v7 = vmul.f32 %v2160_v6, %v422_v3  ;;  %v1707_v6 = vld [vmem:[#allocation4 + $0xe3] ss:$0 sm:$0xff] }
 0x34c   :  { %1880 = vmatprep.mubr.msk.f32.mxu0 %vm140_vm1, %v426_v7 }
 0x34d   :  { %1881 = vmatmul.mubr.msk.f32.vlgmr.msra.gmra.mrb[4].mxu0 %vm140_vm1, %v427_v5 }
 0x34e   :  { %2059 = vmatpush3.bf16.msra.mxu0 %v2056_v38 }
 0x34f   :  { %2061 = vmatprep.subr.bf16.mxu0 %v2060_v40 }
 0x352   :  { %2063 = vmatpush3.bf16.msra.mxu0 %v2060_v40  ;;  %v1710_v40 = vld [vmem:[#allocation4 + $0xe6] ss:$0 sm:$0xff] }
 0x353   :  { %2065 = vmatprep.subr.bf16.mxu0 %v2064_v43 }
 0x356   :  { %2067 = vmatpush3.bf16.msra.mxu0 %v2064_v43 }
 0x357   :  { %2069 = vmatprep.subr.bf16.mxu0 %v2068_v62 }
 0x35a   :  { %2071 = vmatpush3.bf16.msra.mxu0 %v2068_v62  ;;  %v1089_v62 = vld [vmem:[#allocation4 + $0x120] sm:$0xff] }
 0x35b   :  { %2089 = vmatprep.subr.bf16.mxu0 %v2295_v19 }
 0x420   :  { %v1882_v9 = vpop.f32.mrb[4].mxu0 }
 0x421   :  { %v515_v10 = vadd.f32 %v1882_v9, %v1699_v8  ;;  %v509_v11 = vpop.f32.mrb[5].mxu0 }
 0x422   :  { %v510_v12 = vadd.f32 %v1699_v8, %v509_v11 }
 0x423   :  { %v519_v13 = vadd.f32 %v515_v10, %v2289_v16 }
 0x424   :  { %v518_v14 = vadd.f32 %v510_v12, %v2287_v15  ;;  %v561_v15 = vld [vmem:[#allocation4 + $0x80] sm:$0xff] }
 0x425   :  { %v525_v17 = vsel %vm140_vm1, %v519_v13, 0.0  ;;  %v2048_v31 = vpack.c.bf16 %v562_v30, %v561_v15  ;;  %v792_v30 = vld [vmem:[#allocation4 + $0xf8] sm:$0xff] }
 0x426   :  { %526 = vadd.xlane.f32.xlu1 %v525_v17  ;;  %v522_v18 = vsel %vm140_vm1, %v518_v14, 0.0 }
 0x427   :  { %523 = vadd.xlane.f32.xlu0 %v522_v18  ;;  %2049 = vmatprep.subr.bf16.mxu1 %v2048_v31 }
 0x428   :  { %2051 = vmatpush3.bf16.msra.mxu1 %v2048_v31  ;;  %v793_v31 = vld [vmem:[#allocation4 + $0x100] sm:$0xff] }
 0x429   :  { %2053 = vmatprep.subr.bf16.mxu1 %v2052_v34  ;;  %v2076_v32 = vpack.c.bf16 %v793_v31, %v792_v30 }
 0x42c   :  { %2055 = vmatpush3.bf16.msra.mxu1 %v2052_v34 }
 0x4b3   :  { %v527_v20 = vpop.xlane.xlu1 %526 }
 0x4b4   :  { %v530_v21 = vmul.f32 0.03125, %v527_v20  ;;  %v524_v23 = vpop.xlane.xlu0 %523 }
 0x4b5   :  { %v529_v24 = vmul.f32 0.03125, %v524_v23 }
 0x4b6   :  { %v532_v25 = vsub.f32 %v519_v13, %v530_v21 }
 0x4b7   :  { %v531_v26 = vsub.f32 %v518_v14, %v529_v24 }
 0x4b8   :  { %v534_v29 = vmul.f32 %v532_v25, %v532_v25 }
 0x4b9   :  { %v533_v27 = vmul.f32 %v531_v26, %v531_v26 }
 0x4ba   :  { %v538_v16 = vsel %vm140_vm1, %v534_v29, 0.0  ;;  %v790_v29 = vld [vmem:[#allocation4 + $0xe8] sm:$0xff] }
 0x4bb   :  { %v535_v28 = vsel %vm140_vm1, %v533_v27, 0.0 }
 0x4bc   :  { %536 = vadd.xlane.f32.xlu0 %v535_v28 }
 0x4c0   :  { %539 = vadd.xlane.f32.xlu0 %v538_v16  ;;  %v791_v16 = vld [vmem:[#allocation4 + $0xf0] sm:$0xff] }
 0x4c1   :  { %v2072_v15 = vpack.c.bf16 %v791_v16, %v790_v29 }
 0x4c3   :  { %2073 = vmatprep.subr.bf16.mxu1 %v2072_v15 }
 0x549   :  { %v537_v44 = vpop.xlane.xlu0 %536 }
 0x54a   :  { %v541_v45 = vmul.f32 0.03125, %v537_v44  ;;  %v1711_v44 = vld [vmem:[#allocation4 + $0xe7] ss:$0 sm:$0xff] }
 0x54c   :  { %v543_v46 = vadd.f32 1e-05, %v541_v45 }
 0x54d   :  { %v540_v47 = vpop.xlane.xlu0 %539 }
 0x54e   :  { %2161 = vrsqrt.f32 %v543_v46  ;;  %v542_v48 = vmul.f32 0.03125, %v540_v47 }
 0x550   :  { %v544_v49 = vadd.f32 1e-05, %v542_v48 }
 0x552   :  { %2163 = vrsqrt.f32 %v544_v49  ;;  %v1712_v49 = vld [vmem:[#allocation4 + $0x188] ss:$0 sm:$0xff] }
 0x558   :  { %v2162_v50 = vpop.eup %2161 }
 0x559   :  { %v547_v52 = vmul.f32 %v2162_v50, %v531_v26 }
 0x55b   :  { %v553_v54 = vmul.f32 %v1702_v51, %v547_v52 }
 0x55c   :  { %v2164_v55 = vpop.eup %2163 }
 0x55d   :  { %v548_v56 = vmul.f32 %v2164_v55, %v532_v25  ;;  %v559_v57 = vadd.f32 %v1703_v53, %v553_v54 }
 0x55f   :  { %v554_v58 = vmul.f32 %v1702_v51, %v548_v56  ;;  %1891 = vmatprep.mubr.msk.f32.mxu1 %vm140_vm1, %v559_v57 }
 0x561   :  { %v560_v59 = vadd.f32 %v1703_v53, %v554_v58 }
 0x563   :  { %1892 = vmatmul.mubr.msk.f32.vlgmr.msra.gmra.mrb[4].mxu1 %vm140_vm1, %v560_v59 }
 0x564   :  { %2075 = vmatpush3.bf16.msra.mxu1 %v2072_v15 }
 0x565   :  { %2077 = vmatprep.subr.bf16.mxu1 %v2076_v32 }
 0x568   :  { %2079 = vmatpush3.bf16.msra.mxu1 %v2076_v32 }
 0x569   :  { %2081 = vmatprep.subr.bf16.mxu1 %v2295_v19 }
 0x636   :  { %v1893_v0 = vpop.f32.mrb[4].mxu1 }
 0x637   :  { %v648_v1 = vadd.f32 %v1893_v0, %v1704_v63  ;;  %v642_v2 = vpop.f32.mrb[5].mxu1 }
 0x638   :  { %v643_v3 = vadd.f32 %v1704_v63, %v642_v2  ;;  %v2100_v63 = vpack.c.bf16 %v1089_v62, %v1088_v60 }
 0x639   :  { %v652_v5 = vmax.f32 %v648_v1, 0.0 }
 0x63a   :  { %v651_v4 = vmax.f32 %v643_v3, 0.0 }
 0x63c   :  { %1910 = vmatprep.mubr.msk.f32.mxu0 %vm666_vm2, %v651_v4 }
 0x63d   :  { %1911 = vmatmul.mubr.msk.f32.vlgmr.msra.gmra.mrb[6].mxu0 %vm666_vm2, %v652_v5 }
 0x63e   :  { %2091 = vmatpush3.bf16.msra.mxu0 %v2295_v19 }
 0x63f   :  { %2093 = vmatprep.subr.bf16.mxu0 %v2301_v22 }
 0x642   :  { %2095 = vmatpush3.bf16.msra.mxu0 %v2301_v22 }
 0x710   :  { %v1912_v7 = vpop.f32.mrb[6].mxu0 }
 0x711   :  { %v745_v8 = vadd.f32 %v1912_v7, %v1707_v6  ;;  %v739_v9 = vpop.f32.mrb[7].mxu0 }
 0x712   :  { %v740_v10 = vadd.f32 %v1707_v6, %v739_v9 }
 0x713   :  { %v749_v11 = vadd.f32 %v745_v8, %v560_v59  ;;  %v1087_v59 = vld [vmem:[#allocation4 + $0x110] sm:$0xff] }
 0x714   :  { %v748_v12 = vadd.f32 %v740_v10, %v559_v57 }
 0x715   :  { %v755_v13 = vsel %vm140_vm1, %v749_v11, 0.0 }
 0x716   :  { %756 = vadd.xlane.f32.xlu0 %v755_v13  ;;  %v752_v14 = vsel %vm140_vm1, %v748_v12, 0.0 }
 0x717   :  { %753 = vadd.xlane.f32.xlu1 %v752_v14 }
 0x7a3   :  { %v757_v17 = vpop.xlane.xlu0 %756 }
 0x7a4   :  { %v759_v18 = vmul.f32 0.03125, %v757_v17  ;;  %v754_v20 = vpop.xlane.xlu1 %753 }
 0x7a5   :  { %v758_v21 = vmul.f32 0.03125, %v754_v20 }
 0x7a6   :  { %v761_v23 = vsub.f32 %v749_v11, %v759_v18 }
 0x7a7   :  { %v760_v24 = vsub.f32 %v748_v12, %v758_v21 }
 0x7a8   :  { %v763_v25 = vmul.f32 %v761_v23, %v761_v23 }
 0x7a9   :  { %v762_v26 = vmul.f32 %v760_v24, %v760_v24 }
 0x7aa   :  { %v767_v27 = vsel %vm140_vm1, %v763_v25, 0.0 }
 0x7ab   :  { %768 = vadd.xlane.f32.xlu0 %v767_v27  ;;  %v764_v28 = vsel %vm140_vm1, %v762_v26, 0.0 }
 0x7ac   :  { %765 = vadd.xlane.f32.xlu1 %v764_v28 }
 0x838   :  { %v769_v33 = vpop.xlane.xlu0 %768 }
 0x839   :  { %v771_v34 = vmul.f32 0.03125, %v769_v33  ;;  %v766_v35 = vpop.xlane.xlu1 %765 }
 0x83a   :  { %v770_v36 = vmul.f32 0.03125, %v766_v35 }
 0x83b   :  { %v773_v37 = vadd.f32 1e-05, %v771_v34  ;;  %v1719_v34 = vld [vmem:[#allocation4 + $0x189] ss:$0 sm:$0xff] }
 0x83c   :  { %v772_v38 = vadd.f32 1e-05, %v770_v36 }
 0x83d   :  { %2165 = vrsqrt.f32 %v773_v37 }
 0x83e   :  { %2167 = vrsqrt.f32 %v772_v38 }
 0x847   :  { %v2166_v39 = vpop.eup %2165 }
 0x848   :  { %v2168_v41 = vpop.eup %2167  ;;  %v777_v42 = vmul.f32 %v2166_v39, %v761_v23 }
 0x849   :  { %v776_v43 = vmul.f32 %v2168_v41, %v760_v24 }
 0x84a   :  { %v783_v45 = vmul.f32 %v1710_v40, %v777_v42 }
 0x84b   :  { %v782_v46 = vmul.f32 %v1710_v40, %v776_v43 }
 0x84c   :  { %v2338_v48 = vadd.f32 %v1711_v44, %v783_v45 }
 0x84d   :  { %v2336_v47 = vadd.f32 %v1711_v44, %v782_v46 }
 0x84f   :  { %1921 = vmatprep.mubr.msk.f32.mxu1 %vm140_vm1, %v2336_v47 }
 0x850   :  { %1922 = vmatmul.mubr.msk.f32.vlgmr.msra.gmra.mrb[6].mxu1 %vm140_vm1, %v2338_v48 }
 0x851   :  { %2083 = vmatpush3.bf16.msra.mxu1 %v2295_v19 }
 0x852   :  { %2085 = vmatprep.subr.bf16.mxu1 %v2301_v22 }
 0x855   :  { %2087 = vmatpush3.bf16.msra.mxu1 %v2301_v22  ;;  %v1086_v22 = vld [vmem:[#allocation4 + $0x108] sm:$0xff] }
 0x856   :  { %v2096_v61 = vpack.c.bf16 %v1087_v59, %v1086_v22  ;;  %v1311_v22 = vld [vmem:[#allocation4 + $0x150] sm:$0xff]  ;;  %v1312_v59 = vld [vmem:[#allocation4 + $0x158] sm:$0xff] }
 0x858   :  { %2097 = vmatprep.subr.bf16.mxu1 %v2096_v61 }
 0x923   :  { %v1923_v50 = vpop.f32.mrb[6].mxu1 }
 0x924   :  { %v877_v51 = vadd.f32 %v1923_v50, %v1712_v49  ;;  %v871_v52 = vpop.f32.mrb[7].mxu1 }
 0x925   :  { %v872_v53 = vadd.f32 %v1712_v49, %v871_v52 }
 0x926   :  { %884 = vrot.lane.b32.xlu0 %v877_v51, %s2242_s6 }
 0x927   :  { %882 = vrot.lane.b32.xlu1 %v872_v53, %s2242_s6 }
 0x92b   :  { %1070 = vrot.lane.b32.xlu1 %v872_v53, %s2241_s1 }
 0x92f   :  { %1072 = vrot.lane.b32.xlu1 %v877_v51, %s2241_s1 }
 0x998   :  { %v885_v54 = vpop.permute.xlu0 %884 }
 0x999   :  { %v971_v55 = vmul.f32 %v885_v54, %v872_v53  ;;  %v883_v19 = vpop.permute.xlu1 %882  ;;  %v889_v58 = vmul.f32 %v885_v54, %v877_v51  ;;  %v1219_v54 = vld [vmem:[#allocation4 + $0x130] sm:$0xff] }
 0x99a   :  { %v888_v56 = vmul.f32 %v883_v19, %v872_v53  ;;  %v972_v57 = vmul.f32 %v883_v19, %v877_v51  ;;  %v1220_v19 = vld [vmem:[#allocation4 + $0x138] sm:$0xff] }
 0x99b   :  { %1943 = vmatprep.mubr.msk.f32.mxu0 %vm140_vm1, %v971_v55 }
 0x99c   :  { %1932 = vmatprep.mubr.msk.f32.mxu1 %vm140_vm1, %v888_v56  ;;  %1944 = vmatmul.mubr.msk.f32.vlgmr.msra.gmra.mrb[8].mxu0 %vm140_vm1, %v972_v57  ;;  %v1221_v56 = vld [vmem:[#allocation4 + $0x140] sm:$0xff] }
 0x99d   :  { %1933 = vmatmul.mubr.msk.f32.vlgmr.msra.gmra.mrb[8].mxu1 %vm140_vm1, %v889_v58  ;;  %v1071_v14 = vpop.permute.xlu1 %1070  ;;  %v2108_v57 = vpack.c.bf16 %v1221_v56, %v1220_v19  ;;  %v1310_v58 = vld [vmem:[#allocation4 + $0x148] sm:$0xff] }
 0x99e   :  { %2099 = vmatpush3.bf16.msra.mxu1 %v2096_v61  ;;  %v2112_v60 = vpack.c.bf16 %v1311_v22, %v1310_v58  ;;  %v1313_v61 = vld [vmem:[#allocation4 + $0x160] sm:$0xff] }
 0x99f   :  { %2101 = vmatprep.subr.bf16.mxu1 %v2100_v63  ;;  %v2116_v62 = vpack.c.bf16 %v1313_v61, %v1312_v59 }
 0x9a1   :  { %v1073_v18 = vpop.permute.xlu1 %1072 }
 0x9a2   :  { %2103 = vmatpush3.bf16.msra.mxu1 %v2100_v63  ;;  %v1314_v63 = vld [vmem:[#allocation4 + $0x168] sm:$0xff] }
 0x9a3   :  { %2113 = vmatprep.subr.bf16.mxu1 %v2112_v60 }
 0xa6f   :  { %v1945_v0 = vpop.f32.mrb[8].mxu0 }
 0xa70   :  { %v1934_v1 = vpop.f32.mrb[8].mxu1  ;;  %v1045_v2 = vpop.f32.mrb[9].mxu0 }
 0xa71   :  { %v1055_v3 = vmax.f32 %v1934_v1, %v1945_v0  ;;  %v962_v4 = vpop.f32.mrb[9].mxu1 }
 0xa72   :  { %v1054_v5 = vmax.f32 %v962_v4, %v1045_v2 }
 0xa73   :  { %v1057_v6 = vsub.f32 %v1934_v1, %v1055_v3  ;;  %v1063_v7 = vsub.f32 %v1945_v0, %v1055_v3  ;;  %v1315_v0 = vld [vmem:[#allocation4 + $0x170] sm:$0xff] }
 0xa74   :  { %v1056_v8 = vsub.f32 %v962_v4, %v1054_v5  ;;  %v1062_v9 = vsub.f32 %v1045_v2, %v1054_v5  ;;  %v2120_v1 = vpack.c.bf16 %v1315_v0, %v1314_v63 }
 0xa75   :  { %v1060_v10 = vmul.f32 1.442695, %v1057_v6  ;;  %v1066_v11 = vmul.f32 1.442695, %v1063_v7 }
 0xa76   :  { %v1058_v12 = vmul.f32 1.442695, %v1056_v8  ;;  %v1064_v13 = vmul.f32 1.442695, %v1062_v9  ;;  %v1722_v9 = vld [vmem:[#allocation4 + $0x18c] ss:$0 sm:$0xff] }
 0xa77   :  { %2169 = vpow2.f32 %v1060_v10 }
 0xa78   :  { %2171 = vpow2.f32 %v1066_v11  ;;  %v1723_v11 = vld [vmem:[#allocation4 + $0x18d] ss:$0 sm:$0xff] }
 0xa79   :  { %2173 = vpow2.f32 %v1058_v12 }
 0xa7a   :  { %2175 = vpow2.f32 %v1064_v13 }
 0xa81   :  { %v2170_v17 = vpop.eup %2169 }
 0xa82   :  { %v2172_v20 = vpop.eup %2171  ;;  %v1077_v21 = vmul.f32 %v2170_v17, %v1073_v18 }
 0xa83   :  { %v2174_v23 = vpop.eup %2173  ;;  %v1069_v24 = vadd.f32 %v2172_v20, %v2170_v17  ;;  %v1079_v25 = vmul.f32 %v2172_v20, %v1071_v14 }
 0xa84   :  { %v2176_v26 = vpop.eup %2175  ;;  %v1076_v27 = vmul.f32 %v2174_v23, %v1071_v14 }
 0xa85   :  { %2177 = vrcp.f32 %v1069_v24  ;;  %v1068_v28 = vadd.f32 %v2176_v26, %v2174_v23  ;;  %v1078_v29 = vmul.f32 %v2176_v26, %v1073_v18  ;;  %v1081_v16 = vadd.f32 %v1079_v25, %v1077_v21  ;;  %v1316_v21 = vld [vmem:[#allocation4 + $0x178] sm:$0xff]  ;;  %v1317_v23 = vld [vmem:[#allocation4 + $0x180] sm:$0xff]  ;;  %v1724_v25 = vld [vmem:[#allocation4 + $0x18a] ss:$0 sm:$0xff] }
 0xa86   :  { %v2124_v24 = vpack.c.bf16 %v1317_v23, %v1316_v21  ;;  %v1735_v23 = vld [vmem:[#allocation4 + $0x1b9] ss:$0 sm:$0xff] }
 0xa87   :  { %2179 = vrcp.f32 %v1068_v28  ;;  %v1080_v15 = vadd.f32 %v1078_v29, %v1076_v27 }
 0xa8f   :  { %v2178_v30 = vpop.eup %2177 }
 0xa90   :  { %v1085_v31 = vmul.f32 %v2178_v30, %v1081_v16  ;;  %v1727_v30 = vld [vmem:[#allocation4 + $0x18b] ss:$0 sm:$0xff] }
 0xa91   :  { %v2180_v32 = vpop.eup %2179 }
 0xa92   :  { %v1084_v33 = vmul.f32 %v2180_v32, %v1080_v15 }
 0xa94   :  { %1954 = vmatprep.mubr.msk.f32.mxu1 %vm140_vm1, %v1084_v33 }
 0xa95   :  { %1955 = vmatmul.mubr.msk.f32.vlgmr.msra.gmra.mrb[10].mxu1 %vm140_vm1, %v1085_v31 }
 0xa96   :  { %2115 = vmatpush3.bf16.msra.mxu1 %v2112_v60  ;;  %v1731_v60 = vld [vmem:[#allocation4 + $0x18f] ss:$0 sm:$0xff] }
 0xa97   :  { %2117 = vmatprep.subr.bf16.mxu1 %v2116_v62 }
 0xa9a   :  { %2119 = vmatpush3.bf16.msra.mxu1 %v2116_v62 }
 0xa9b   :  { %2121 = vmatprep.subr.bf16.mxu1 %v2120_v1 }
 0xa9e   :  { %2123 = vmatpush3.bf16.msra.mxu1 %v2120_v1  ;;  %v1520_v1 = vld [vmem:[#allocation4 + $0x198] sm:$0xff] }
 0xa9f   :  { %2125 = vmatprep.subr.bf16.mxu1 %v2124_v24 }
 0xaa2   :  { %2127 = vmatpush3.bf16.msra.mxu1 %v2124_v24 }
 0xb68   :  { %v1956_v35 = vpop.f32.mrb[10].mxu1 }
 0xb69   :  { %v1173_v36 = vadd.f32 %v1956_v35, %v1719_v34  ;;  %v1167_v37 = vpop.f32.mrb[11].mxu1 }
 0xb6a   :  { %v1168_v38 = vadd.f32 %v1719_v34, %v1167_v37 }
 0xb6b   :  { %v1177_v39 = vadd.f32 %v1173_v36, %v2338_v48 }
 0xb6c   :  { %v1176_v40 = vadd.f32 %v1168_v38, %v2336_v47  ;;  %v1218_v47 = vld [vmem:[#allocation4 + $0x128] sm:$0xff] }
 0xb6d   :  { %v1183_v41 = vsel %vm140_vm1, %v1177_v39, 0.0  ;;  %v2104_v55 = vpack.c.bf16 %v1219_v54, %v1218_v47 }
 0xb6e   :  { %1184 = vadd.xlane.f32.xlu1 %v1183_v41  ;;  %v1180_v42 = vsel %vm140_vm1, %v1176_v40, 0.0 }
 0xb6f   :  { %1181 = vadd.xlane.f32.xlu0 %v1180_v42  ;;  %2105 = vmatprep.subr.bf16.mxu0 %v2104_v55 }
 0xb70   :  { %2107 = vmatpush3.bf16.msra.mxu0 %v2104_v55 }
 0xb71   :  { %2109 = vmatprep.subr.bf16.mxu0 %v2108_v57 }
 0xb74   :  { %2111 = vmatpush3.bf16.msra.mxu0 %v2108_v57  ;;  %v1730_v57 = vld [vmem:[#allocation4 + $0x18e] ss:$0 sm:$0xff] }
 0xbfb   :  { %v1185_v43 = vpop.xlane.xlu1 %1184 }
 0xbfc   :  { %v1187_v44 = vmul.f32 0.03125, %v1185_v43  ;;  %v1182_v45 = vpop.xlane.xlu0 %1181 }
 0xbfd   :  { %v1186_v46 = vmul.f32 0.03125, %v1182_v45 }
 0xbfe   :  { %v1189_v49 = vsub.f32 %v1177_v39, %v1187_v44 }
 0xbff   :  { %v1188_v50 = vsub.f32 %v1176_v40, %v1186_v46 }
 0xc00   :  { %v1191_v53 = vmul.f32 %v1189_v49, %v1189_v49 }
 0xc01   :  { %v1190_v51 = vmul.f32 %v1188_v50, %v1188_v50 }
 0xc02   :  { %v1195_v48 = vsel %vm140_vm1, %v1191_v53, 0.0 }
 0xc03   :  { %v1192_v52 = vsel %vm140_vm1, %v1190_v51, 0.0  ;;  %v2243_v51 = vmov 0.0|0.0  }
 0xc04   :  { %1193 = vadd.xlane.f32.xlu0 %v1192_v52  ;;  %2128 = vmatprep.subr.bf16.mxu0 %v2243_v51  ;;  %v2245_v52 = vmov 0.0  }
 0xc08   :  { %1196 = vadd.xlane.f32.xlu0 %v1195_v48 }
 0xc91   :  { %v1194_v2 = vpop.xlane.xlu0 %1193 }
 0xc92   :  { %v1198_v3 = vmul.f32 0.03125, %v1194_v2  ;;  %v1521_v2 = vld [vmem:[#allocation4 + $0x1a0] sm:$0xff] }
 0xc94   :  { %v1200_v4 = vadd.f32 1e-05, %v1198_v3 }
 0xc95   :  { %v1197_v5 = vpop.xlane.xlu0 %1196 }
 0xc96   :  { %2181 = vrsqrt.f32 %v1200_v4  ;;  %v1199_v6 = vmul.f32 0.03125, %v1197_v5  ;;  %v1446_v4 = vld [vmem:[#allocation4 + $0x190] sm:$0xff]  ;;  %v2132_v5 = vpack.c.bf16 %v1521_v2, %v1520_v1 }
 0xc98   :  { %v1201_v7 = vadd.f32 1e-05, %v1199_v6  ;;  %v1522_v6 = vld [vmem:[#allocation4 + $0x1a8] sm:$0xff] }
 0xc9a   :  { %2183 = vrsqrt.f32 %v1201_v7  ;;  %v1523_v7 = vld [vmem:[#allocation4 + $0x1b0] sm:$0xff] }
 0xca0   :  { %v2182_v8 = vpop.eup %2181 }
 0xca1   :  { %v1204_v10 = vmul.f32 %v2182_v8, %v1188_v50  ;;  %v2135_v8 = vpack.c.bf16 %v1523_v7, %v1522_v6 }
 0xca3   :  { %v1210_v12 = vmul.f32 %v1722_v9, %v1204_v10 }
 0xca4   :  { %v2184_v13 = vpop.eup %2183 }
 0xca5   :  { %v1205_v14 = vmul.f32 %v2184_v13, %v1189_v49  ;;  %v1216_v17 = vadd.f32 %v1723_v11, %v1210_v12  ;;  %v1604_v12 = vld [vmem:[#allocation4 + $0x1c8] sm:$0xff] }
 0xca7   :  { %v1211_v18 = vmul.f32 %v1722_v9, %v1205_v14  ;;  %1965 = vmatprep.mubr.msk.f32.mxu0 %vm140_vm1, %v1216_v17  ;;  %v1733_v14 = vld [vmem:[#allocation4 + $0x1b8] ss:$0 sm:$0xff] }
 0xca9   :  { %v1217_v20 = vadd.f32 %v1723_v11, %v1211_v18  ;;  %v1603_v11 = vld [vmem:[#allocation4 + $0x1c0] sm:$0xff] }
 0xcaa   :  { %v2138_v13 = vpack.c.bf16 %v1604_v12, %v1603_v11 }
 0xcab   :  { %1966 = vmatmul.mubr.msk.f32.vlgmr.msra.gmra.mrb[10].mxu0 %vm140_vm1, %v1217_v20 }
 0xcac   :  { %1991 = vmatprep.mubr.msk.f32.mxu0 %vm2244_vm3, %v2245_v52 }
 0xd7e   :  { %v1967_v26 = vpop.f32.mrb[10].mxu0 }
 0xd7f   :  { %v1305_v27 = vadd.f32 %v1967_v26, %v1724_v25  ;;  %v1299_v28 = vpop.f32.mrb[11].mxu0 }
 0xd80   :  { %v1300_v29 = vadd.f32 %v1724_v25, %v1299_v28 }
 0xd81   :  { %v1309_v15 = vmax.f32 %v1305_v27, 0.0 }
 0xd82   :  { %v1308_v16 = vmax.f32 %v1300_v29, 0.0 }
 0xd84   :  { %1984 = vmatprep.mubr.msk.f32.mxu1 %vm666_vm2, %v1308_v16 }
 0xd85   :  { %1985 = vmatmul.mubr.msk.f32.vlgmr.msra.gmra.mrb[12].mxu1 %vm666_vm2, %v1309_v15 }
 0xe58   :  { %v1986_v31 = vpop.f32.mrb[12].mxu1 }
 0xe59   :  { %v1401_v32 = vadd.f32 %v1986_v31, %v1727_v30  ;;  %v1395_v33 = vpop.f32.mrb[13].mxu1 }
 0xe5a   :  { %v1396_v34 = vadd.f32 %v1727_v30, %v1395_v33 }
 0xe5b   :  { %v1405_v35 = vadd.f32 %v1401_v32, %v1217_v20 }
 0xe5c   :  { %v1404_v36 = vadd.f32 %v1396_v34, %v1216_v17 }
 0xe5d   :  { %v1411_v37 = vsel %vm140_vm1, %v1405_v35, 0.0 }
 0xe5e   :  { %1412 = vadd.xlane.f32.xlu0 %v1411_v37  ;;  %v1408_v38 = vsel %vm140_vm1, %v1404_v36, 0.0 }
 0xe5f   :  { %1409 = vadd.xlane.f32.xlu1 %v1408_v38 }
 0xeeb   :  { %v1413_v39 = vpop.xlane.xlu0 %1412 }
 0xeec   :  { %v1415_v40 = vmul.f32 0.03125, %v1413_v39  ;;  %v1410_v41 = vpop.xlane.xlu1 %1409 }
 0xeed   :  { %v1414_v42 = vmul.f32 0.03125, %v1410_v41 }
 0xeee   :  { %v1417_v43 = vsub.f32 %v1405_v35, %v1415_v40 }
 0xeef   :  { %v1416_v44 = vsub.f32 %v1404_v36, %v1414_v42 }
 0xef0   :  { %v1419_v45 = vmul.f32 %v1417_v43, %v1417_v43 }
 0xef1   :  { %v1418_v46 = vmul.f32 %v1416_v44, %v1416_v44 }
 0xef2   :  { %v1423_v49 = vsel %vm140_vm1, %v1419_v45, 0.0 }
 0xef3   :  { %1424 = vadd.xlane.f32.xlu0 %v1423_v49  ;;  %v1420_v50 = vsel %vm140_vm1, %v1418_v46, 0.0 }
 0xef4   :  { %1421 = vadd.xlane.f32.xlu1 %v1420_v50 }
 0xf80   :  { %v1425_v53 = vpop.xlane.xlu0 %1424 }
 0xf81   :  { %v1427_v48 = vmul.f32 0.03125, %v1425_v53  ;;  %v1422_v47 = vpop.xlane.xlu1 %1421 }
 0xf82   :  { %v1426_v54 = vmul.f32 0.03125, %v1422_v47 }
 0xf83   :  { %v1429_v55 = vadd.f32 1e-05, %v1427_v48 }
 0xf84   :  { %v1428_v19 = vadd.f32 1e-05, %v1426_v54 }
 0xf85   :  { %2185 = vrsqrt.f32 %v1429_v55 }
 0xf86   :  { %2187 = vrsqrt.f32 %v1428_v19 }
 0xf8f   :  { %v2186_v56 = vpop.eup %2185 }
 0xf90   :  { %v2188_v58 = vpop.eup %2187  ;;  %v1433_v22 = vmul.f32 %v2186_v56, %v1417_v43 }
 0xf91   :  { %v1432_v59 = vmul.f32 %v2188_v58, %v1416_v44 }
 0xf92   :  { %v1439_v61 = vmul.f32 %v1730_v57, %v1433_v22 }
 0xf93   :  { %v1438_v62 = vmul.f32 %v1730_v57, %v1432_v59 }
 0xf94   :  { %v1445_v63 = vadd.f32 %v1731_v60, %v1439_v61 }
 0xf95   :  { %v1444_v0 = vadd.f32 %v1731_v60, %v1438_v62 }
 0xf97   :  { %v2129_v3 = vpack.c.bf16 %v1445_v63, %v1444_v0 }
 0xf99   :  { %2130 = vmatpush3.bf16.msra.mxu0 %v2129_v3 }
 0xf9a   :  { %2131 = vmatprep.subr.bf16.mxu0 %v2243_v51 }
 0xf9c   :  { %1992 = vmatmul.mubr.msk.f32.vlgmr.msra.gmra.mrb[12].mxu0 %vm45_vm0, %v1446_v4 }
 0xf9d   :  { %2133 = vmatpush3.bf16.msra.mxu0 %v2132_v5  ;;  %2002 = vmatprep.mubr.msk.f32.mxu0 %vm2244_vm3, %v2245_v52 }
 0xf9e   :  { %2134 = vmatprep.subr.bf16.mxu0 %v2243_v51 }
 0xfa1   :  { %2136 = vmatpush3.bf16.msra.mxu0 %v2135_v8 }
 0xfa2   :  { %2137 = vmatprep.subr.bf16.mxu0 %v2243_v51 }
0x106f   :  { %v1516_v9 = vpop.f32.mrb[12].mxu0 }
0x1070   :  { %v1993_v10 = vpop.f32.mrb[13].mxu0  ;;  %2003 = vmatmul.mubr.msk.f32.vlgmr.msra.gmra.mrb[14].mxu0 %vm140_vm1, %v1516_v9 }
0x1071   :  { %2009 = vmatprep.mubr.msk.f32.mxu0 %vm2244_vm3, %v2245_v52  ;;  %2139 = vmatpush3.bf16.msra.mxu0 %v2138_v13 }
0x1143   :  { %v1598_v17 = vpop.f32.mrb[14].mxu0 }
0x1144   :  { %v1599_v18 = vadd.f32 %v1733_v14, %v1598_v17  ;;  %v2004_v20 = vpop.f32.mrb[15].mxu0 }
0x1146   :  { %v1602_v21 = vmax.f32 %v1599_v18, 0.0 }
0x1148   :  { %2010 = vmatmul.mubr.msk.f32.vlgmr.msra.gmra.mrb[16].mxu0 %vm45_vm0, %v1602_v21 }
0x121b   :  { %v1679_v24 = vpop.f32.mrb[16].mxu0 }
0x121c   :  { %v1680_v25 = vadd.f32 %v1735_v23, %v1679_v24  ;;  %v2011_v26 = vpop.f32.mrb[17].mxu0 }
0x121e   :  { %1683 = vst [vmem:[%s2382_s2] sm:$0xff] %v1680_v25 }
0x121f   :  { %1688 = vsyncpa [#allocation3], 1 }
0x1220   :  { %1689 = vsyncpa [#allocation5], 1 }

</bundles_post_ra>
